<compile_context>
chip_gen: v7x
topology: tpu7x:2x2x1
jax: 0.10.0
libtpu: 0.0.40
codegen_flags: <defaults>
</compile_context>

<pallas_src>
import jax
import jax.numpy as jnp
from jax import lax
from jax.experimental import pallas as pl
from jax.experimental.pallas import tpu as pltpu

EPS = 1e-5           # nn.BatchNorm1d default eps
NEG_SLOPE = 0.01     # nn.LeakyReLU default negative_slope


def _bn_fused(y, gamma, beta):
    # Training-mode BatchNorm1d folded into one broadcast FMA:
    #   scale = gamma * rsqrt(var + eps);  shift = beta - mu * scale;  y*scale + shift
    # One-pass biased stats in f32: mu = E[y], var = max(E[y^2] - mu^2, 0).
    inv_n = 1.0 / y.shape[0]
    mu = jnp.sum(y, axis=0, keepdims=True) * inv_n
    ex2 = jnp.sum(y * y, axis=0, keepdims=True) * inv_n
    var = jnp.maximum(ex2 - mu * mu, 0.0)
    scale = gamma * lax.rsqrt(var + EPS)
    shift = beta - mu * scale
    return y * scale + shift


def _leaky_relu(y, slope=NEG_SLOPE):
    return jnp.where(y >= 0, y, slope * y)


def lc_kernel(x_ref, w_in_ref, pack_ref, w_h1_ref, w_h2_ref,
              w_out_ref, b_out_ref, o_ref):
    pack = pack_ref[...]   # (8, hid) f32: rows = [g1, be1, g_h1, be_h1, g_h2, be_h2, 0, 0]

    # input_layer + bn1.  Linear bias dropped: cancelled exactly by BN mean
    # subtraction (training mode).  bf16 MXU inputs, f32 accumulation.
    x = x_ref[...].astype(jnp.bfloat16)
    y = jnp.dot(x, w_in_ref[...], preferred_element_type=jnp.float32)
    y = _bn_fused(y, pack[0:1, :], pack[1:2, :])

    # hidden layer 1: Linear(bias dropped) -> BN -> LeakyReLU
    y = jnp.dot(y.astype(jnp.bfloat16), w_h1_ref[...],
                preferred_element_type=jnp.float32)
    y = _leaky_relu(_bn_fused(y, pack[2:3, :], pack[3:4, :]))

    # hidden layer 2: Linear(bias dropped) -> BN -> LeakyReLU, immediately
    # followed by act1: two LeakyReLUs fused into a single select (slope^2 on
    # the negative side matches applying LeakyReLU twice).
    y = jnp.dot(y.astype(jnp.bfloat16), w_h2_ref[...],
                preferred_element_type=jnp.float32)
    y = _bn_fused(y, pack[4:5, :], pack[5:6, :])
    y = _leaky_relu(y, slope=NEG_SLOPE * NEG_SLOPE)

    # out_layer (bias kept; no BN follows).
    o_ref[...] = (jnp.dot(y.astype(jnp.bfloat16), w_out_ref[...],
                          preferred_element_type=jnp.float32)
                  + b_out_ref[...]).astype(o_ref.dtype)


def prepare_params(params):
    """One-time packing / casting of parameters for the kernel. Call once, reuse."""
    hid = params["w_in"].shape[1]
    pack = jnp.concatenate(
        [params["g1"], params["be1"],
         params["g_h1"], params["be_h1"],
         params["g_h2"], params["be_h2"],
         jnp.zeros((2, hid), jnp.float32)], axis=0)          # (8, hid) f32
    return dict(
        w_in=params["w_in"].astype(jnp.bfloat16),            # (in_dim, hid)
        w_h1=params["w_h1"].astype(jnp.bfloat16),             # (hid, hid)
        w_h2=params["w_h2"].astype(jnp.bfloat16),             # (hid, hid)
        w_out=params["w_out"].astype(jnp.bfloat16),           # (hid, ncls)
        b_out=params["b_out"],                                # (1, ncls) f32
        pack=pack,
    )


def lc_forward(x, pp):
    """Hot path: no per-call padding/packing, single-block pallas_call."""
    B, in_dim = x.shape
    hid = pp["w_in"].shape[1]
    ncls = pp["w_out"].shape[1]

    args = (x, pp["w_in"], pp["pack"], pp["w_h1"], pp["w_h2"],
            pp["w_out"], pp["b_out"])

    flops = 2 * B * (in_dim * hid + 2 * hid * hid + hid * ncls)
    bytes_accessed = (4 * (x.size + pp["pack"].size + pp["b_out"].size + B * ncls)
                      + 2 * (pp["w_in"].size + pp["w_h1"].size
                             + pp["w_h2"].size + pp["w_out"].size))

    return pl.pallas_call(
        lc_kernel,
        out_shape=jax.ShapeDtypeStruct((B, ncls), jnp.float32),
        in_specs=[pl.BlockSpec(memory_space=pltpu.MemorySpace.VMEM)] * len(args),
        out_specs=pl.BlockSpec(memory_space=pltpu.MemorySpace.VMEM),
        cost_estimate=pl.CostEstimate(flops=flops, transcendentals=3 * hid,
                                      bytes_accessed=bytes_accessed),
    )(*args)


def init_params(key, in_dim, hid, ncls):
    ks = jax.random.split(key, 8)

    def linear(k, fan_in, fan_out):
        kw, kb = jax.random.split(k)
        bound = 1.0 / (fan_in ** 0.5)
        w = jax.random.uniform(kw, (fan_in, fan_out), jnp.float32, -bound, bound)
        b = jax.random.uniform(kb, (1, fan_out), jnp.float32, -bound, bound)
        return w, b

    w_in, b_in = linear(ks[0], in_dim, hid)
    w_h1, b_h1 = linear(ks[1], hid, hid)
    w_h2, b_h2 = linear(ks[2], hid, hid)
    w_out, b_out = linear(ks[3], hid, ncls)
    ones = jnp.ones((1, hid), jnp.float32)
    zeros = jnp.zeros((1, hid), jnp.float32)
    return dict(
        w_in=w_in, b_in=b_in, g1=ones, be1=zeros,
        w_h1=w_h1, b_h1=b_h1, g_h1=ones, be_h1=zeros,
        w_h2=w_h2, b_h2=b_h2, g_h2=ones, be_h2=zeros,
        w_out=w_out, b_out=b_out,
    )


def _bn_ref(y, gamma, beta):
    mu = jnp.mean(y, axis=0, keepdims=True)
    var = jnp.mean((y - mu) ** 2, axis=0, keepdims=True)
    return (y - mu) * lax.rsqrt(var + EPS) * gamma + beta


def lc_reference(x, p):
    # Faithful f32 port of the PyTorch forward (biases included, two-pass BN).
    y = x @ p["w_in"] + p["b_in"]
    y = _bn_ref(y, p["g1"], p["be1"])
    y = y @ p["w_h1"] + p["b_h1"]
    y = _leaky_relu(_bn_ref(y, p["g_h1"], p["be_h1"]))
    y = y @ p["w_h2"] + p["b_h2"]
    y = _leaky_relu(_bn_ref(y, p["g_h2"], p["be_h2"]))
    y = _leaky_relu(y)
    return y @ p["w_out"] + p["b_out"]


if __name__ == "__main__":
    B, IN_DIM, HID, NCLS = 8, 32, 128, 16

    key = jax.random.PRNGKey(0)
    k_x, k_p = jax.random.split(key)
    x = jax.random.normal(k_x, (B, IN_DIM), jnp.float32)
    params = init_params(k_p, IN_DIM, HID, NCLS)

    packed = prepare_params(params)          # one-time packing, not per call
    lc = jax.jit(lc_forward)

    out = lc(x, packed)
    out = jax.block_until_ready(out)

    ref = lc_reference(x, params)
    assert out.shape == (B, NCLS)
    # bf16 MXU inputs widen the tolerance vs. the pure-f32 reference.
    assert jnp.allclose(out, ref, atol=5e-2, rtol=5e-2)

    print("KERNEL_OK")
</pallas_src>

<mosaic_0001>
module attributes {stable_mosaic.version = 11 : i64} {
  func.func @lc_kernel(%arg0: memref<8x32xf32, #tpu.memory_space<vmem>>, %arg1: memref<32x128xbf16, #tpu.memory_space<vmem>>, %arg2: memref<8x128xf32, #tpu.memory_space<vmem>>, %arg3: memref<128x128xbf16, #tpu.memory_space<vmem>>, %arg4: memref<128x128xbf16, #tpu.memory_space<vmem>>, %arg5: memref<128x16xbf16, #tpu.memory_space<vmem>>, %arg6: memref<1x16xf32, #tpu.memory_space<vmem>>, %arg7: memref<8x16xf32, #tpu.memory_space<vmem>>) attributes {dimension_semantics = [], scalar_prefetch = 0 : i64, scratch_operands = 0 : i64, tpu.core_type = #tpu.core_type<tc>} {
    %c0 = arith.constant 0 : index
    %c0_0 = arith.constant 0 : index
    %0 = vector.load %arg2[%c0, %c0_0] : memref<8x128xf32, #tpu.memory_space<vmem>>, vector<8x128xf32>
    %c0_1 = arith.constant 0 : index
    %c0_2 = arith.constant 0 : index
    %1 = vector.load %arg0[%c0_1, %c0_2] : memref<8x32xf32, #tpu.memory_space<vmem>>, vector<8x32xf32>
    %2 = arith.truncf %1 : vector<8x32xf32> to vector<8x32xbf16>
    %c0_3 = arith.constant 0 : index
    %c0_4 = arith.constant 0 : index
    %3 = vector.load %arg1[%c0_3, %c0_4] : memref<32x128xbf16, #tpu.memory_space<vmem>>, vector<32x128xbf16>
    %cst = arith.constant dense<0.000000e+00> : vector<8x128xf32>
    %4 = tpu.matmul %2, %3, %cst {dimension_numbers = #tpu.dot_dimension_numbers<[1], [0], [0], [1], [0, 0, 1, 1], [], []>} : vector<8x32xbf16>, vector<32x128xbf16>, vector<8x128xf32> -> vector<8x128xf32>
    %5 = vector.extract_strided_slice %0 {offsets = [0, 0], sizes = [1, 128], strides = [1, 1]} : vector<8x128xf32> to vector<1x128xf32>
    %6 = vector.extract_strided_slice %0 {offsets = [1, 0], sizes = [1, 128], strides = [1, 1]} : vector<8x128xf32> to vector<1x128xf32>
    %cst_5 = arith.constant dense<0.000000e+00> : vector<128xf32>
    %7 = vector.multi_reduction <add>, %4, %cst_5 [0] : vector<8x128xf32> to vector<128xf32>
    %8 = vector.shape_cast %7 : vector<128xf32> to vector<1x128xf32>
    %cst_6 = arith.constant 1.250000e-01 : f32
    %9 = vector.broadcast %cst_6 : f32 to vector<1x128xf32>
    %10 = arith.mulf %8, %9 : vector<1x128xf32>
    %11 = arith.mulf %4, %4 : vector<8x128xf32>
    %cst_7 = arith.constant dense<0.000000e+00> : vector<128xf32>
    %12 = vector.multi_reduction <add>, %11, %cst_7 [0] : vector<8x128xf32> to vector<128xf32>
    %13 = vector.shape_cast %12 : vector<128xf32> to vector<1x128xf32>
    %cst_8 = arith.constant 1.250000e-01 : f32
    %14 = vector.broadcast %cst_8 : f32 to vector<1x128xf32>
    %15 = arith.mulf %13, %14 : vector<1x128xf32>
    %16 = arith.mulf %10, %10 : vector<1x128xf32>
    %17 = arith.subf %15, %16 : vector<1x128xf32>
    %cst_9 = arith.constant 0.000000e+00 : f32
    %18 = vector.broadcast %cst_9 : f32 to vector<1x128xf32>
    %19 = arith.maximumf %17, %18 : vector<1x128xf32>
    %cst_10 = arith.constant 9.99999974E-6 : f32
    %20 = vector.broadcast %cst_10 : f32 to vector<1x128xf32>
    %21 = arith.addf %19, %20 : vector<1x128xf32>
    %22 = math.rsqrt %21 : vector<1x128xf32>
    %23 = arith.mulf %5, %22 : vector<1x128xf32>
    %24 = arith.mulf %10, %23 : vector<1x128xf32>
    %25 = arith.subf %6, %24 : vector<1x128xf32>
    %26 = vector.broadcast %23 : vector<1x128xf32> to vector<8x128xf32>
    %27 = arith.mulf %4, %26 : vector<8x128xf32>
    %28 = vector.broadcast %25 : vector<1x128xf32> to vector<8x128xf32>
    %29 = arith.addf %27, %28 : vector<8x128xf32>
    %30 = arith.truncf %29 : vector<8x128xf32> to vector<8x128xbf16>
    %c0_11 = arith.constant 0 : index
    %c0_12 = arith.constant 0 : index
    %31 = vector.load %arg3[%c0_11, %c0_12] : memref<128x128xbf16, #tpu.memory_space<vmem>>, vector<128x128xbf16>
    %cst_13 = arith.constant dense<0.000000e+00> : vector<8x128xf32>
    %32 = tpu.matmul %30, %31, %cst_13 {dimension_numbers = #tpu.dot_dimension_numbers<[1], [0], [0], [1], [0, 0, 1, 1], [], []>} : vector<8x128xbf16>, vector<128x128xbf16>, vector<8x128xf32> -> vector<8x128xf32>
    %33 = vector.extract_strided_slice %0 {offsets = [2, 0], sizes = [1, 128], strides = [1, 1]} : vector<8x128xf32> to vector<1x128xf32>
    %34 = vector.extract_strided_slice %0 {offsets = [3, 0], sizes = [1, 128], strides = [1, 1]} : vector<8x128xf32> to vector<1x128xf32>
    %cst_14 = arith.constant dense<0.000000e+00> : vector<128xf32>
    %35 = vector.multi_reduction <add>, %32, %cst_14 [0] : vector<8x128xf32> to vector<128xf32>
    %36 = vector.shape_cast %35 : vector<128xf32> to vector<1x128xf32>
    %cst_15 = arith.constant 1.250000e-01 : f32
    %37 = vector.broadcast %cst_15 : f32 to vector<1x128xf32>
    %38 = arith.mulf %36, %37 : vector<1x128xf32>
    %39 = arith.mulf %32, %32 : vector<8x128xf32>
    %cst_16 = arith.constant dense<0.000000e+00> : vector<128xf32>
    %40 = vector.multi_reduction <add>, %39, %cst_16 [0] : vector<8x128xf32> to vector<128xf32>
    %41 = vector.shape_cast %40 : vector<128xf32> to vector<1x128xf32>
    %cst_17 = arith.constant 1.250000e-01 : f32
    %42 = vector.broadcast %cst_17 : f32 to vector<1x128xf32>
    %43 = arith.mulf %41, %42 : vector<1x128xf32>
    %44 = arith.mulf %38, %38 : vector<1x128xf32>
    %45 = arith.subf %43, %44 : vector<1x128xf32>
    %cst_18 = arith.constant 0.000000e+00 : f32
    %46 = vector.broadcast %cst_18 : f32 to vector<1x128xf32>
    %47 = arith.maximumf %45, %46 : vector<1x128xf32>
    %cst_19 = arith.constant 9.99999974E-6 : f32
    %48 = vector.broadcast %cst_19 : f32 to vector<1x128xf32>
    %49 = arith.addf %47, %48 : vector<1x128xf32>
    %50 = math.rsqrt %49 : vector<1x128xf32>
    %51 = arith.mulf %33, %50 : vector<1x128xf32>
    %52 = arith.mulf %38, %51 : vector<1x128xf32>
    %53 = arith.subf %34, %52 : vector<1x128xf32>
    %54 = vector.broadcast %51 : vector<1x128xf32> to vector<8x128xf32>
    %55 = arith.mulf %32, %54 : vector<8x128xf32>
    %56 = vector.broadcast %53 : vector<1x128xf32> to vector<8x128xf32>
    %57 = arith.addf %55, %56 : vector<8x128xf32>
    %cst_20 = arith.constant 0.000000e+00 : f32
    %58 = vector.broadcast %cst_20 : f32 to vector<8x128xf32>
    %59 = arith.cmpf oge, %57, %58 : vector<8x128xf32>
    %cst_21 = arith.constant 0.00999999977 : f32
    %60 = vector.broadcast %cst_21 : f32 to vector<8x128xf32>
    %61 = arith.mulf %60, %57 : vector<8x128xf32>
    %62 = arith.select %59, %57, %61 : vector<8x128xi1>, vector<8x128xf32>
    %63 = arith.truncf %62 : vector<8x128xf32> to vector<8x128xbf16>
    %c0_22 = arith.constant 0 : index
    %c0_23 = arith.constant 0 : index
    %64 = vector.load %arg4[%c0_22, %c0_23] : memref<128x128xbf16, #tpu.memory_space<vmem>>, vector<128x128xbf16>
    %cst_24 = arith.constant dense<0.000000e+00> : vector<8x128xf32>
    %65 = tpu.matmul %63, %64, %cst_24 {dimension_numbers = #tpu.dot_dimension_numbers<[1], [0], [0], [1], [0, 0, 1, 1], [], []>} : vector<8x128xbf16>, vector<128x128xbf16>, vector<8x128xf32> -> vector<8x128xf32>
    %66 = vector.extract_strided_slice %0 {offsets = [4, 0], sizes = [1, 128], strides = [1, 1]} : vector<8x128xf32> to vector<1x128xf32>
    %67 = vector.extract_strided_slice %0 {offsets = [5, 0], sizes = [1, 128], strides = [1, 1]} : vector<8x128xf32> to vector<1x128xf32>
    %cst_25 = arith.constant dense<0.000000e+00> : vector<128xf32>
    %68 = vector.multi_reduction <add>, %65, %cst_25 [0] : vector<8x128xf32> to vector<128xf32>
    %69 = vector.shape_cast %68 : vector<128xf32> to vector<1x128xf32>
    %cst_26 = arith.constant 1.250000e-01 : f32
    %70 = vector.broadcast %cst_26 : f32 to vector<1x128xf32>
    %71 = arith.mulf %69, %70 : vector<1x128xf32>
    %72 = arith.mulf %65, %65 : vector<8x128xf32>
    %cst_27 = arith.constant dense<0.000000e+00> : vector<128xf32>
    %73 = vector.multi_reduction <add>, %72, %cst_27 [0] : vector<8x128xf32> to vector<128xf32>
    %74 = vector.shape_cast %73 : vector<128xf32> to vector<1x128xf32>
    %cst_28 = arith.constant 1.250000e-01 : f32
    %75 = vector.broadcast %cst_28 : f32 to vector<1x128xf32>
    %76 = arith.mulf %74, %75 : vector<1x128xf32>
    %77 = arith.mulf %71, %71 : vector<1x128xf32>
    %78 = arith.subf %76, %77 : vector<1x128xf32>
    %cst_29 = arith.constant 0.000000e+00 : f32
    %79 = vector.broadcast %cst_29 : f32 to vector<1x128xf32>
    %80 = arith.maximumf %78, %79 : vector<1x128xf32>
    %cst_30 = arith.constant 9.99999974E-6 : f32
    %81 = vector.broadcast %cst_30 : f32 to vector<1x128xf32>
    %82 = arith.addf %80, %81 : vector<1x128xf32>
    %83 = math.rsqrt %82 : vector<1x128xf32>
    %84 = arith.mulf %66, %83 : vector<1x128xf32>
    %85 = arith.mulf %71, %84 : vector<1x128xf32>
    %86 = arith.subf %67, %85 : vector<1x128xf32>
    %87 = vector.broadcast %84 : vector<1x128xf32> to vector<8x128xf32>
    %88 = arith.mulf %65, %87 : vector<8x128xf32>
    %89 = vector.broadcast %86 : vector<1x128xf32> to vector<8x128xf32>
    %90 = arith.addf %88, %89 : vector<8x128xf32>
    %cst_31 = arith.constant 0.000000e+00 : f32
    %91 = vector.broadcast %cst_31 : f32 to vector<8x128xf32>
    %92 = arith.cmpf oge, %90, %91 : vector<8x128xf32>
    %cst_32 = arith.constant 9.99999974E-5 : f32
    %93 = vector.broadcast %cst_32 : f32 to vector<8x128xf32>
    %94 = arith.mulf %93, %90 : vector<8x128xf32>
    %95 = arith.select %92, %90, %94 : vector<8x128xi1>, vector<8x128xf32>
    %96 = arith.truncf %95 : vector<8x128xf32> to vector<8x128xbf16>
    %c0_33 = arith.constant 0 : index
    %c0_34 = arith.constant 0 : index
    %97 = vector.load %arg5[%c0_33, %c0_34] : memref<128x16xbf16, #tpu.memory_space<vmem>>, vector<128x16xbf16>
    %cst_35 = arith.constant dense<0.000000e+00> : vector<8x16xf32>
    %98 = tpu.matmul %96, %97, %cst_35 {dimension_numbers = #tpu.dot_dimension_numbers<[1], [0], [0], [1], [0, 0, 1, 1], [], []>} : vector<8x128xbf16>, vector<128x16xbf16>, vector<8x16xf32> -> vector<8x16xf32>
    %c0_36 = arith.constant 0 : index
    %c0_37 = arith.constant 0 : index
    %99 = vector.load %arg6[%c0_36, %c0_37] : memref<1x16xf32, #tpu.memory_space<vmem>>, vector<1x16xf32>
    %100 = vector.broadcast %99 : vector<1x16xf32> to vector<8x16xf32>
    %101 = arith.addf %98, %100 : vector<8x16xf32>
    %c0_38 = arith.constant 0 : index
    %c0_39 = arith.constant 0 : index
    %102 = vector.load %arg7[%c0_38, %c0_39] : memref<8x16xf32, #tpu.memory_space<vmem>>, vector<8x16xf32>
    tpu.vector_store %arg7[%c0_38, %c0_39], %101 {strides = array<i32>} : memref<8x16xf32, #tpu.memory_space<vmem>>, vector<8x16xf32>,
    return
  }
}

</mosaic_0001>

<bundles_post_ra>
// kernel: lc_forward.1
= control target key start
LH: loop header
LB: loop body
LE: loop exit
PB: predicated region body
PF: predicated region fallthrough
CT: control target
= control target key end

     0   :  { %12 = vsyncpa [#allocation3], 0  ;;  %s1045_s0 = inlined_call_operand.hbm [shape: f32[8,32], index: 0, kind: input, shape index: {}]   ;;  %s1046_s1 = inlined_call_operand.vmem [shape: bf16[32,128], index: 1, kind: input, shape index: {}]   ;;  %s1047_s2 = inlined_call_operand.hbm [shape: f32[8,128], index: 2, kind: input, shape index: {}]   ;;  %s1048_s3 = inlined_call_operand.vmem [shape: bf16[128,128], index: 3, kind: input, shape index: {}]   ;;  %s1049_s4 = inlined_call_operand.hbm [shape: bf16[128,128], index: 4, kind: input, shape index: {}]   ;;  %s1050_s5 = inlined_call_operand.vmem [shape: bf16[128,16], index: 5, kind: input, shape index: {}]   ;;  %s1051_s6 = inlined_call_operand.vmem [shape: f32[1,16], index: 6, kind: input, shape index: {}]   ;;  %s1052_s7 = inlined_call_operand.hbm [shape: f32[8,16], index: 7, kind: output, shape index: {}]  }
   0x1   :  { %13 = vsyncpa [#allocation6], 0 }
   0x2   :  { %14 = vsyncpa [#allocation4], 0  ;;  %s842_s24 = smov [#allocation5]   ;;  %s843_s26 = smov [#allocation2]  }
   0x3   :  { %s33_s25 = sshll.u32 %s842_s24, 4  ;;  %s21_s27 = sshll.u32 %s843_s26, 4  ;;  %s34_s25 = int_to_ptr.vmem [resolvable:$true] %s33_s25  ;;  %s22_s27 = int_to_ptr.vmem [resolvable:$true] %s21_s27 }
   0x4   :  { %s748_s30 = scalar_lea.hbm %s1047_s2, 128 }
   0x5   :  { %p749_p0 = scmp.ne.s32.totalorder %s1047_s2, %s748_s30  ;;  %p752_p1 = scmp.lt.u32.totalorder %s748_s30, %s1047_s2 }
   0x7   :  { %p754_p2 = pnand %p752_p1, %p749_p0 }
   0x9   :  { %757 = shalt.err (!%p754_p2)
}
   0xa   :  { %s758_s12 = scalar_lea.vmem %s34_s25, 128  ;;  %p763_p4 = scmp.lt.s32.totalorder %s34_s25, %s34_s25 }
   0xb   :  { %p759_p3 = scmp.ne.s32.totalorder %s34_s25, %s758_s12  ;;  %p764_p5 = scmp.lt.s32.totalorder %s758_s12, %s758_s12 }
   0xd   :  { %p765_p6 = por %p764_p5, %p763_p4 }
   0xf   :  { %p766_p7 = pnand %p765_p6, %p759_p3 }
  0x11   :  { %769 = shalt.err (!%p766_p7)
}
  0x12   :  { %36 = dma.hbm_to_vmem [thread:$0]  %s1047_s2, 128, %s34_s25, [#allocation6]  }
  0x13   :  { %s770_s17 = scalar_lea.hbm %s1045_s0, 128 }
  0x14   :  { %p771_p8 = scmp.ne.s32.totalorder %s1045_s0, %s770_s17  ;;  %p774_p9 = scmp.lt.u32.totalorder %s770_s17, %s1045_s0 }
  0x16   :  { %p776_p10 = pnand %p774_p9, %p771_p8 }
  0x18   :  { %779 = shalt.err (!%p776_p10)
}
  0x19   :  { %s780_s22 = scalar_lea.vmem %s22_s27, 128  ;;  %p785_p12 = scmp.lt.s32.totalorder %s22_s27, %s22_s27 }
  0x1a   :  { %p781_p11 = scmp.ne.s32.totalorder %s22_s27, %s780_s22  ;;  %p786_p13 = scmp.lt.s32.totalorder %s780_s22, %s780_s22 }
  0x1c   :  { %p787_p0 = por %p786_p13, %p785_p12 }
  0x1e   :  { %p788_p1 = pnand %p787_p0, %p781_p11 }
  0x20   :  { %791 = shalt.err (!%p788_p1)
}
  0x21   :  { %24 = dma.hbm_to_vmem [thread:$0]  %s1045_s0, 128, %s22_s27, [#allocation3]  }
  0x22   :  { %s844_s24 = smov [#allocation7]   ;;  %s792_s29 = scalar_lea.hbm %s1049_s4, 1024 }
  0x23   :  { %s44_s25 = sshll.u32 %s844_s24, 4  ;;  %p793_p2 = scmp.ne.s32.totalorder %s1049_s4, %s792_s29  ;;  %s45_s25 = int_to_ptr.vmem [resolvable:$true] %s44_s25 }
  0x24   :  { %p796_p3 = scmp.lt.u32.totalorder %s792_s29, %s1049_s4 }
  0x26   :  { %p798_p4 = pnand %p796_p3, %p793_p2 }
  0x28   :  { %801 = shalt.err (!%p798_p4)
}
  0x29   :  { %s802_s11 = scalar_lea.vmem %s45_s25, 1024  ;;  %p807_p6 = scmp.lt.s32.totalorder %s45_s25, %s45_s25 }
  0x2a   :  { %p803_p5 = scmp.ne.s32.totalorder %s45_s25, %s802_s11  ;;  %p808_p7 = scmp.lt.s32.totalorder %s802_s11, %s802_s11 }
  0x2c   :  { %p809_p8 = por %p808_p7, %p807_p6 }
  0x2e   :  { %p810_p9 = pnand %p809_p8, %p803_p5 }
  0x30   :  { %813 = shalt.err (!%p810_p9)
}
  0x31   :  { %s845_s0 = smov 64   ;;  %s846_s27 = smov 4  }
  0x32   :  { %50 = dma.hbm_to_vmem [thread:$0]  %s1049_s4, 1024, %s45_s25, [#allocation6], %s845_s0, %s845_s0, %s846_s27  }
  0x33   :  { %836 = dma.done.wait [#allocation3], 128  }
  0x34   :  { %837 = vsyncadd [#allocation3], 4294967168 }
  0x35   :  { %838 = dma.done.wait [#allocation6], 1152  }
  0x36   :  { %839 = vsyncadd [#allocation6], 4294966144  ;;  %v847_v0 = vmov 0.0   ;;  %vm848_vm0 = vmmov 0   ;;  %v716_v1 = vld [vmem:[%s1046_s1] sm:$0xff]   ;;  %v717_v2 = vld [vmem:[%s1046_s1 + $0x8] sm:$0xff]   ;;  %v154_v36 = vlaneseq }
  0x37   :  { %640 = vmatprep.subr.bf16.mxu0 %v847_v0  ;;  %644 = vmatprep.mubr.msk.bf16.mxu0 %vm848_vm0, %v847_v0  ;;  %v66_v3 = vld [vmem:[#allocation2] sm:$0xff]  ;;  %vm84_vm1 = vcmask 261120   ;;  %v719_v6 = vld [vmem:[%s1048_s3 + $0x8] sm:$0xff]   ;;  %v720_v7 = vld [vmem:[%s1048_s3 + $0x10] sm:$0xff]   ;;  %s849_s21 = smov [#allocation8]   ;;  %vm564_vm4 = vcmask 130048  }
  0x38   :  { %648 = vmatprep.subr.bf16.mxu1 %v847_v0  ;;  %664 = vmatprep.mubr.msk.bf16.mxu1 %vm848_vm0, %v847_v0  ;;  %v67_v4 = vpack.c.bf16 %v66_v3, %v66_v3  ;;  %v718_v5 = vld [vmem:[%s1048_s3] sm:$0xff]   ;;  %v721_v8 = vld [vmem:[%s1048_s3 + $0x18] sm:$0xff]   ;;  %v723_v10 = vld [vmem:[%s1048_s3 + $0x28] sm:$0xff]   ;;  %v974_v37 = vshrl.u32 %v154_v36, 7  ;;  %s572_s22 = sshll.u32 %s849_s21, 4  ;;  %s573_s22 = int_to_ptr.vmem [resolvable:$true] %s572_s22 }
  0x39   :  { %641 = vmatpush3.bf16.msra.mxu0 %v716_v1  ;;  %649 = vmatpush3.bf16.msra.mxu1 %v718_v5  ;;  %v722_v9 = vld [vmem:[%s1048_s3 + $0x20] sm:$0xff]   ;;  %v724_v11 = vld [vmem:[%s1048_s3 + $0x30] sm:$0xff]   ;;  %v725_v12 = vld [vmem:[%s1048_s3 + $0x38] sm:$0xff]   ;;  %s814_s2 = scalar_lea.vmem %s573_s22, 128  ;;  %p819_p11 = scmp.lt.s32.totalorder %s573_s22, %s573_s22 }
  0x3a   :  { %642 = vmatprep.subr.bf16.mxu0 %v847_v0  ;;  %650 = vmatprep.subr.bf16.mxu1 %v847_v0  ;;  %v976_v38 = vld [vmem:[#allocation5] sm:$0xff]  ;;  %v156_v41 = vsub.s32 0, %v974_v37  ;;  %v161_v45 = vsub.s32 1, %v974_v37  ;;  %v726_v51 = vld [vmem:[#allocation7] sm:$0xff]   ;;  %v727_v52 = vld [vmem:[#allocation7 + $0x8] sm:$0xff]   ;;  %p815_p10 = scmp.ne.s32.totalorder %s573_s22, %s814_s2  ;;  %p820_p12 = scmp.lt.s32.totalorder %s814_s2, %s814_s2 }
  0x3b   :  { %v728_v53 = vld [vmem:[#allocation7 + $0x10] sm:$0xff]   ;;  %v729_v54 = vld [vmem:[#allocation7 + $0x18] sm:$0xff]   ;;  %v730_v55 = vld [vmem:[#allocation7 + $0x20] sm:$0xff]  }
  0x3c   :  { %v731_v56 = vld [vmem:[#allocation7 + $0x28] sm:$0xff]   ;;  %v732_v57 = vld [vmem:[#allocation7 + $0x30] sm:$0xff]   ;;  %v733_v58 = vld [vmem:[#allocation7 + $0x38] sm:$0xff]   ;;  %p821_p13 = por %p820_p12, %p819_p11 }
  0x3d   :  { %643 = vmatpush3.bf16.msra.mxu0 %v717_v2  ;;  %651 = vmatpush3.bf16.msra.mxu1 %v719_v6  ;;  %v737_v36 = vld [vmem:[%s1050_s5 + $0x18] sm:$0xff]  }
  0x3e   :  { %668 = vmatprep.subr.bf16.mxu0 %v847_v0  ;;  %652 = vmatprep.subr.bf16.mxu1 %v847_v0  ;;  %p822_p0 = pnand %p821_p13, %p815_p10 }
  0x40   :  { %645 = vmatmul.mubr.msk.bf16.vlgmr.msra.gmra.mrb[0].mxu0 %vm84_vm1, %v67_v4 }
  0x41   :  { %684 = vmatprep.mubr.msk.bf16.mxu0 %vm848_vm0, %v847_v0  ;;  %653 = vmatpush3.bf16.msra.mxu1 %v720_v7 }
  0x42   :  { %654 = vmatprep.subr.bf16.mxu1 %v847_v0  ;;  %669 = vmatpush3.bf16.msra.mxu0 %v726_v51 }
  0x43   :  { %670 = vmatprep.subr.bf16.mxu0 %v847_v0 }
  0x45   :  { %655 = vmatpush3.bf16.msra.mxu1 %v721_v8 }
  0x46   :  { %656 = vmatprep.subr.bf16.mxu1 %v847_v0  ;;  %671 = vmatpush3.bf16.msra.mxu0 %v727_v52 }
  0x47   :  { %672 = vmatprep.subr.bf16.mxu0 %v847_v0 }
  0x49   :  { %657 = vmatpush3.bf16.msra.mxu1 %v722_v9 }
  0x4a   :  { %658 = vmatprep.subr.bf16.mxu1 %v847_v0  ;;  %673 = vmatpush3.bf16.msra.mxu0 %v728_v53 }
  0x4b   :  { %674 = vmatprep.subr.bf16.mxu0 %v847_v0 }
  0x4d   :  { %659 = vmatpush3.bf16.msra.mxu1 %v723_v10 }
  0x4e   :  { %660 = vmatprep.subr.bf16.mxu1 %v847_v0  ;;  %675 = vmatpush3.bf16.msra.mxu0 %v729_v54 }
  0x4f   :  { %676 = vmatprep.subr.bf16.mxu0 %v847_v0 }
  0x51   :  { %661 = vmatpush3.bf16.msra.mxu1 %v724_v11 }
  0x52   :  { %662 = vmatprep.subr.bf16.mxu1 %v847_v0  ;;  %677 = vmatpush3.bf16.msra.mxu0 %v730_v55 }
  0x53   :  { %678 = vmatprep.subr.bf16.mxu0 %v847_v0 }
  0x55   :  { %663 = vmatpush3.bf16.msra.mxu1 %v725_v12 }
  0x56   :  { %688 = vmatprep.subr.bf16.mxu1 %v847_v0  ;;  %679 = vmatpush3.bf16.msra.mxu0 %v731_v56 }
  0x57   :  { %680 = vmatprep.subr.bf16.mxu0 %v847_v0 }
  0x5a   :  { %681 = vmatpush3.bf16.msra.mxu0 %v732_v57 }
  0x5b   :  { %682 = vmatprep.subr.bf16.mxu0 %v847_v0 }
  0x5e   :  { %683 = vmatpush3.bf16.msra.mxu0 %v733_v58 }
 0x113   :  { %v122_v13 = vpop.f32.mrb[0].mxu0 }
 0x114   :  { %v128_v14 = vrot.slane %v122_v13, 4  ;;  %v135_v15 = vmul.f32 %v122_v13, %v122_v13  ;;  %v646_v16 = vpop.f32.mrb[1].mxu0 }
 0x115   :  { %v125_v17 = vpop.f32.mrb[2].mxu0 }
 0x116   :  { %v129_v18 = vadd.f32 %v128_v14, %v122_v13  ;;  %v136_v19 = vrot.slane %v135_v15, 4  ;;  %v647_v20 = vpop.f32.mrb[3].mxu0 }
 0x118   :  { %v130_v21 = vrot.slane %v129_v18, 2  ;;  %v137_v22 = vadd.f32 %v136_v19, %v135_v15 }
 0x11a   :  { %v131_v23 = vadd.f32 %v130_v21, %v129_v18  ;;  %v138_v24 = vrot.slane %v137_v22, 2  ;;  %v297_v21 = vsub.s32 2, %v974_v37 }
 0x11c   :  { %v132_v25 = vrot.slane %v131_v23, 1  ;;  %v139_v26 = vadd.f32 %v138_v24, %v137_v22 }
 0x11e   :  { %v133_v27 = vadd.f32 %v132_v25, %v131_v23  ;;  %v140_v28 = vrot.slane %v139_v26, 1  ;;  %v302_v25 = vsub.s32 3, %v974_v37 }
 0x120   :  { %v134_v29 = vmul.f32 0.125, %v133_v27  ;;  %v141_v30 = vadd.f32 %v140_v28, %v139_v26 }
 0x122   :  { %v142_v31 = vmul.f32 0.125, %v141_v30  ;;  %v143_v32 = vmul.f32 %v134_v29, %v134_v29 }
 0x124   :  { %v144_v33 = vsub.f32 %v142_v31, %v143_v32 }
 0x126   :  { %v145_v34 = vmax.f32 %v144_v33, 0.0  ;;  %v734_v33 = vld [vmem:[%s1050_s5] sm:$0xff]  }
 0x128   :  { %v146_v35 = vadd.f32 1e-05, %v145_v34  ;;  %v735_v34 = vld [vmem:[%s1050_s5 + $0x8] sm:$0xff]  }
 0x12a   :  { %742 = vrsqrt.f32 %v146_v35  ;;  %v736_v35 = vld [vmem:[%s1050_s5 + $0x10] sm:$0xff]  }
 0x134   :  { %v743_v39 = vpop.eup %742 }
 0x135   :  { %v148_v40 = vmul.f32 %v743_v39, %v976_v38  ;;  %v738_v39 = vld [vmem:[%s1050_s5 + $0x20] sm:$0xff]  }
 0x137   :  { %v149_v42 = vmul.f32 %v148_v40, %v134_v29  ;;  %v157_v43 = vrot.slane %v148_v40, %v156_v41  ;;  %v739_v40 = vld [vmem:[%s1050_s5 + $0x28] sm:$0xff]   ;;  %v740_v41 = vld [vmem:[%s1050_s5 + $0x30] sm:$0xff]  }
 0x139   :  { %v151_v44 = vrot.slane %v149_v42, 7  ;;  %v158_v47 = vmul.f32 %v157_v43, %v122_v13  ;;  %v741_v42 = vld [vmem:[%s1050_s5 + $0x38] sm:$0xff]  }
 0x13b   :  { %v153_v46 = vsub.f32 %v976_v38, %v151_v44 }
 0x13d   :  { %v162_v48 = vrot.slane %v153_v46, %v161_v45 }
 0x13f   :  { %v163_v49 = vadd.f32 %v162_v48, %v158_v47 }
 0x141   :  { %v164_v50 = vpack.c.bf16 %v163_v49, %v163_v49 }
 0x143   :  { %665 = vmatmul.mubr.bf16.vlgmr.msra.gmra.mrb[0].mxu1 %v164_v50 }
 0x144   :  { %704 = vmatprep.mubr.msk.bf16.mxu1 %vm848_vm0, %v847_v0  ;;  %689 = vmatpush3.bf16.msra.mxu1 %v734_v33 }
 0x145   :  { %690 = vmatprep.subr.bf16.mxu1 %v847_v0 }
 0x148   :  { %691 = vmatpush3.bf16.msra.mxu1 %v735_v34 }
 0x149   :  { %692 = vmatprep.subr.bf16.mxu1 %v847_v0 }
 0x14c   :  { %693 = vmatpush3.bf16.msra.mxu1 %v736_v35 }
 0x14d   :  { %694 = vmatprep.subr.bf16.mxu1 %v847_v0 }
 0x150   :  { %695 = vmatpush3.bf16.msra.mxu1 %v737_v36 }
 0x151   :  { %696 = vmatprep.subr.bf16.mxu1 %v847_v0 }
 0x154   :  { %697 = vmatpush3.bf16.msra.mxu1 %v738_v39 }
 0x155   :  { %698 = vmatprep.subr.bf16.mxu1 %v847_v0 }
 0x158   :  { %699 = vmatpush3.bf16.msra.mxu1 %v739_v40 }
 0x159   :  { %700 = vmatprep.subr.bf16.mxu1 %v847_v0 }
 0x15c   :  { %701 = vmatpush3.bf16.msra.mxu1 %v740_v41 }
 0x15d   :  { %702 = vmatprep.subr.bf16.mxu1 %v847_v0 }
 0x160   :  { %703 = vmatpush3.bf16.msra.mxu1 %v741_v42 }
 0x216   :  { %v263_v59 = vpop.f32.mrb[0].mxu1 }
 0x217   :  { %v269_v60 = vrot.slane %v263_v59, 4  ;;  %v276_v61 = vmul.f32 %v263_v59, %v263_v59  ;;  %v666_v62 = vpop.f32.mrb[1].mxu1 }
 0x218   :  { %v266_v63 = vpop.f32.mrb[2].mxu1 }
 0x219   :  { %v270_v1 = vadd.f32 %v269_v60, %v263_v59  ;;  %v277_v2 = vrot.slane %v276_v61, 4  ;;  %v667_v3 = vpop.f32.mrb[3].mxu1 }
 0x21b   :  { %v271_v4 = vrot.slane %v270_v1, 2  ;;  %v278_v5 = vadd.f32 %v277_v2, %v276_v61 }
 0x21d   :  { %v272_v6 = vadd.f32 %v271_v4, %v270_v1  ;;  %v279_v7 = vrot.slane %v278_v5, 2  ;;  %v441_v4 = vsub.s32 4, %v974_v37 }
 0x21f   :  { %v273_v8 = vrot.slane %v272_v6, 1  ;;  %v280_v9 = vadd.f32 %v279_v7, %v278_v5 }
 0x221   :  { %v274_v10 = vadd.f32 %v273_v8, %v272_v6  ;;  %v281_v11 = vrot.slane %v280_v9, 1  ;;  %v446_v8 = vsub.s32 5, %v974_v37 }
 0x223   :  { %v275_v12 = vmul.f32 0.125, %v274_v10  ;;  %v282_v13 = vadd.f32 %v281_v11, %v280_v9 }
 0x225   :  { %v283_v14 = vmul.f32 0.125, %v282_v13  ;;  %v284_v15 = vmul.f32 %v275_v12, %v275_v12 }
 0x227   :  { %v285_v16 = vsub.f32 %v283_v14, %v284_v15 }
 0x229   :  { %v286_v17 = vmax.f32 %v285_v16, 0.0  ;;  %v601_v16 = vld [vmem:[%s1051_s6] ss:$0 sm:$0xff] }
 0x22b   :  { %v287_v18 = vadd.f32 1e-05, %v286_v17 }
 0x22d   :  { %744 = vrsqrt.f32 %v287_v18 }
 0x237   :  { %v745_v19 = vpop.eup %744 }
 0x238   :  { %v289_v20 = vmul.f32 %v745_v19, %v976_v38 }
 0x23a   :  { %v290_v22 = vmul.f32 %v289_v20, %v275_v12  ;;  %v298_v24 = vrot.slane %v289_v20, %v297_v21 }
 0x23c   :  { %v292_v23 = vrot.slane %v290_v22, 7  ;;  %v299_v27 = vmul.f32 %v298_v24, %v263_v59 }
 0x23e   :  { %v294_v26 = vsub.f32 %v976_v38, %v292_v23 }
 0x240   :  { %v303_v28 = vrot.slane %v294_v26, %v302_v25 }
 0x242   :  { %v304_v29 = vadd.f32 %v303_v28, %v299_v27 }
 0x244   :  { %vm305_vm2 = vcmp.ge.f32.partialorder %v304_v29, 0.0  ;;  %v306_v30 = vmul.f32 0.01, %v304_v29 }
 0x246   :  { %v307_v31 = vsel %vm305_vm2, %v304_v29, %v306_v30 }
 0x247   :  { %v308_v32 = vpack.c.bf16 %v307_v31, %v307_v31 }
 0x249   :  { %685 = vmatmul.mubr.bf16.vlgmr.msra.gmra.mrb[4].mxu0 %v308_v32 }
 0x31c   :  { %v407_v43 = vpop.f32.mrb[4].mxu0 }
 0x31d   :  { %v413_v44 = vrot.slane %v407_v43, 4  ;;  %v420_v45 = vmul.f32 %v407_v43, %v407_v43  ;;  %v686_v46 = vpop.f32.mrb[5].mxu0 }
 0x31e   :  { %v410_v47 = vpop.f32.mrb[6].mxu0 }
 0x31f   :  { %v414_v48 = vadd.f32 %v413_v44, %v407_v43  ;;  %v421_v49 = vrot.slane %v420_v45, 4  ;;  %v687_v50 = vpop.f32.mrb[7].mxu0 }
 0x321   :  { %v415_v51 = vrot.slane %v414_v48, 2  ;;  %v422_v52 = vadd.f32 %v421_v49, %v420_v45 }
 0x323   :  { %v416_v53 = vadd.f32 %v415_v51, %v414_v48  ;;  %v423_v54 = vrot.slane %v422_v52, 2 }
 0x325   :  { %v417_v55 = vrot.slane %v416_v53, 1  ;;  %v424_v56 = vadd.f32 %v423_v54, %v422_v52 }
 0x327   :  { %v418_v57 = vadd.f32 %v417_v55, %v416_v53  ;;  %v425_v58 = vrot.slane %v424_v56, 1 }
 0x329   :  { %v419_v59 = vmul.f32 0.125, %v418_v57  ;;  %v426_v60 = vadd.f32 %v425_v58, %v424_v56 }
 0x32b   :  { %v427_v0 = vmul.f32 0.125, %v426_v60  ;;  %v428_v61 = vmul.f32 %v419_v59, %v419_v59 }
 0x32d   :  { %v429_v62 = vsub.f32 %v427_v0, %v428_v61 }
 0x32f   :  { %v430_v63 = vmax.f32 %v429_v62, 0.0 }
 0x331   :  { %v431_v1 = vadd.f32 1e-05, %v430_v63 }
 0x333   :  { %746 = vrsqrt.f32 %v431_v1 }
 0x33d   :  { %v747_v2 = vpop.eup %746 }
 0x33e   :  { %v433_v3 = vmul.f32 %v747_v2, %v976_v38 }
 0x340   :  { %v434_v5 = vmul.f32 %v433_v3, %v419_v59  ;;  %v442_v7 = vrot.slane %v433_v3, %v441_v4 }
 0x342   :  { %v436_v6 = vrot.slane %v434_v5, 7  ;;  %v443_v10 = vmul.f32 %v442_v7, %v407_v43 }
 0x344   :  { %v438_v9 = vsub.f32 %v976_v38, %v436_v6 }
 0x346   :  { %v447_v11 = vrot.slane %v438_v9, %v446_v8 }
 0x348   :  { %v448_v12 = vadd.f32 %v447_v11, %v443_v10 }
 0x34a   :  { %vm449_vm3 = vcmp.ge.f32.partialorder %v448_v12, 0.0  ;;  %v450_v13 = vmul.f32 0.0001, %v448_v12 }
 0x34c   :  { %v451_v14 = vsel %vm449_vm3, %v448_v12, %v450_v13 }
 0x34d   :  { %v452_v15 = vpack.c.bf16 %v451_v14, %v451_v14 }
 0x34f   :  { %705 = vmatmul.mubr.bf16.vlgmr.msra.gmra.mrb[4].mxu1 %v452_v15 }
 0x422   :  { %v558_v17 = vpop.f32.mrb[4].mxu1 }
 0x423   :  { %v559_v18 = vadd.f32 %v601_v16, %v558_v17  ;;  %v706_v37 = vpop.f32.mrb[5].mxu1 }
 0x424   :  { %v561_v38 = vpop.f32.mrb[6].mxu1 }
 0x425   :  { %v707_v19 = vpop.f32.mrb[7].mxu1  ;;  %565 = vst.msk [vmem:[#allocation8] sm:$0xff] %vm564_vm4, %v559_v18 }
 0x426   :  { %825 = shalt.err (!%p822_p0)
}
 0x427   :  { %s826_s6 = scalar_lea.hbm %s1052_s7, 128 }
 0x428   :  { %p827_p1 = scmp.ne.s32.totalorder %s1052_s7, %s826_s6  ;;  %p830_p2 = scmp.lt.u32.totalorder %s826_s6, %s1052_s7 }
 0x42a   :  { %p832_p3 = pnand %p830_p2, %p827_p1 }
 0x42c   :  { %835 = shalt.err (!%p832_p3)
}
 0x42d   :  { %575 = dma.vmem_to_hbm [thread:$0]  %s573_s22, 128, %s1052_s7, [#allocation4]  }
 0x42e   :  { %840 = dma.done.wait [#allocation4], 128  }
 0x42f   :  { %841 = vsyncadd [#allocation4], 4294967168 }
 0x430   :  { %579 = vsyncpa [#allocation3], 1 }
 0x431   :  { %580 = vsyncpa [#allocation6], 1 }
 0x432   :  { %581 = vsyncpa [#allocation4], 1 }

</bundles_post_ra>
